<compile_context>
chip_gen: v7x
topology: tpu7x:2x2x1
jax: 0.10.0
libtpu: 0.0.40
codegen_flags: <defaults>
</compile_context>

<pallas_src>
import functools
import math

import numpy as np
import jax
import jax.numpy as jnp
from jax import lax
from jax.experimental import pallas as pl
from jax.experimental.pallas import tpu as pltpu

BN_EPS = 1e-5
# eval BatchNorm with gamma=1, beta=0, running_mean=0, running_var=1:
BN_SCALE = float(1.0 / math.sqrt(1.0 + BN_EPS))


def _round_up(x, m):
    return (x + m - 1) // m * m


def _pad128(c):
    return _round_up(c, 128)


def _choose_tk(kp):
    """Largest multiple of 128 that divides kp and is <= 512 (no K padding)."""
    u = kp // 128
    best = 1
    for d in range(1, min(u, 4) + 1):
        if u % d == 0:
            best = d
    return 128 * best


# ----------------------------------------------------------------------------
# Pallas kernels: tiled bf16 matmul, f32 accumulate, fused affine (+ReLU)
# epilogue; second variant additionally fuses residual-add + ReLU.
# ----------------------------------------------------------------------------
def _mm_affine_kernel(a_ref, b_ref, s_ref, t_ref, o_ref, acc_ref, *, relu):
    k = pl.program_id(2)

    @pl.when(k == 0)
    def _():
        acc_ref[...] = jnp.zeros_like(acc_ref)

    acc_ref[...] += jnp.dot(a_ref[...], b_ref[...],
                            preferred_element_type=jnp.float32)

    @pl.when(k == pl.num_programs(2) - 1)
    def _():
        y = acc_ref[...] * s_ref[...] + t_ref[...]
        if relu:
            y = jnp.maximum(y, 0.0)
        o_ref[...] = y.astype(o_ref.dtype)


def _mm_affine_res_kernel(a_ref, b_ref, s_ref, t_ref, r_ref, o_ref, acc_ref):
    k = pl.program_id(2)

    @pl.when(k == 0)
    def _():
        acc_ref[...] = jnp.zeros_like(acc_ref)

    acc_ref[...] += jnp.dot(a_ref[...], b_ref[...],
                            preferred_element_type=jnp.float32)

    @pl.when(k == pl.num_programs(2) - 1)
    def _():
        y = acc_ref[...] * s_ref[...] + t_ref[...] + r_ref[...].astype(jnp.float32)
        o_ref[...] = jnp.maximum(y, 0.0).astype(o_ref.dtype)


def _matmul_affine_impl(a, b_mat, s_vec, t_vec, resid=None, *, relu,
                        out_dtype=jnp.bfloat16):
    """out = epilogue((a @ b_mat) * scale + bias [+ resid]); b_mat pre-padded."""
    M, K = a.shape
    Kp, Np = b_mat.shape
    assert K <= Kp and Np % 128 == 0

    tk = _choose_tk(Kp)
    tn = 256 if Np % 256 == 0 else 128
    tm = min(256, _round_up(M, 8))
    Mp = _round_up(M, tm)

    a = a.astype(jnp.bfloat16)
    if (Mp, Kp) != (M, K):
        a = jnp.pad(a, ((0, Mp - M), (0, Kp - K)))

    grid = (Mp // tm, Np // tn, Kp // tk)
    a_spec = pl.BlockSpec((tm, tk), lambda i, j, k: (i, k))
    b_spec = pl.BlockSpec((tk, tn), lambda i, j, k: (k, j))
    v_spec = pl.BlockSpec((1, tn), lambda i, j, k: (0, j))
    o_spec = pl.BlockSpec((tm, tn), lambda i, j, k: (i, j))
    scratch = [pltpu.VMEM((tm, tn), jnp.float32)]
    cparams = pltpu.CompilerParams(
        dimension_semantics=("parallel", "parallel", "arbitrary"),
        vmem_limit_bytes=32 * 1024 * 1024)  # safe on v5e/v6e (128M) and v7x (64M)

    if resid is None:
        out = pl.pallas_call(
            functools.partial(_mm_affine_kernel, relu=relu),
            out_shape=jax.ShapeDtypeStruct((Mp, Np), out_dtype),
            grid_spec=pltpu.PrefetchScalarGridSpec(
                num_scalar_prefetch=0, grid=grid,
                in_specs=[a_spec, b_spec, v_spec, v_spec],
                out_specs=o_spec, scratch_shapes=scratch),
            compiler_params=cparams,
        )(a, b_mat, s_vec, t_vec)
    else:
        r = resid.astype(jnp.bfloat16)
        if r.shape != (Mp, Np):
            r = jnp.pad(r, ((0, Mp - r.shape[0]), (0, Np - r.shape[1])))
        out = pl.pallas_call(
            _mm_affine_res_kernel,
            out_shape=jax.ShapeDtypeStruct((Mp, Np), out_dtype),
            grid_spec=pltpu.PrefetchScalarGridSpec(
                num_scalar_prefetch=0, grid=grid,
                in_specs=[a_spec, b_spec, v_spec, v_spec,
                          pl.BlockSpec((tm, tn), lambda i, j, k: (i, j))],
                out_specs=o_spec, scratch_shapes=scratch),
            compiler_params=cparams,
        )(a, b_mat, s_vec, t_vec, r)

    if Mp != M:
        out = out[:M]           # drop padded rows only (channels stay padded)
    return out


matmul_affine = jax.jit(_matmul_affine_impl,
                        static_argnames=("relu", "out_dtype"))


# ----------------------------------------------------------------------------
# Convolution: 1x1 via reshape, kxk via bf16 im2col; matmul does BN(+ReLU).
# ----------------------------------------------------------------------------
def _im2col(x, kh, kw, stride, pad, dilation):
    n, h, w, c = x.shape
    xp = jnp.pad(x, ((0, 0), (pad, pad), (pad, pad), (0, 0)))
    ho = (h + 2 * pad - dilation * (kh - 1) - 1) // stride + 1
    wo = (w + 2 * pad - dilation * (kw - 1) - 1) // stride + 1
    cols = []
    for i in range(kh):
        for j in range(kw):
            h0 = i * dilation
            w0 = j * dilation
            cols.append(xp[:, h0:h0 + (ho - 1) * stride + 1:stride,
                           w0:w0 + (wo - 1) * stride + 1:stride, :])
    a = jnp.concatenate(cols, axis=-1).reshape(n * ho * wo, kh * kw * c)
    return a, ho, wo


def conv(x, wp, *, stride=1, pad=0, dilation=1, relu=True, resid=None,
         out_dtype=jnp.bfloat16):
    """x: NHWC bf16 with channel dim already padded to wp's expected cin_pad."""
    kh, kw = wp['kh'], wp['kw']
    n = x.shape[0]
    if kh == 1 and kw == 1 and pad == 0:
        xs = x[:, ::stride, ::stride, :] if stride > 1 else x
        ho, wo = xs.shape[1], xs.shape[2]
        a = xs.reshape(n * ho * wo, xs.shape[3])
    else:
        a, ho, wo = _im2col(x, kh, kw, stride, pad, dilation)
    r = None
    if resid is not None:
        r = resid.reshape(n * ho * wo, resid.shape[-1])
    y = matmul_affine(a, wp['w'], wp['s'], wp['t'], resid=r,
                      relu=relu, out_dtype=out_dtype)
    return y.reshape(n, ho, wo, wp['w'].shape[1])


# ----------------------------------------------------------------------------
# Weight preparation (done ONCE at init): pad cin to the activation's padded
# channel count, reshape to (K, Cout), pad to (Kp, Np), cast to bf16, and
# fold the eval-BN affine into per-column scale/bias vectors.
# ----------------------------------------------------------------------------
def prep_conv(w, scale, bias, cin_pad):
    kh, kw, cin, cout = w.shape
    if cin_pad > cin:
        w = jnp.pad(w, ((0, 0), (0, 0), (0, cin_pad - cin), (0, 0)))
    K = kh * kw * cin_pad
    Kp = _round_up(K, 128)
    Np = _pad128(cout)
    b = w.reshape(K, cout)
    b = jnp.pad(b, ((0, Kp - K), (0, Np - cout))).astype(jnp.bfloat16)
    s = jnp.pad(scale.astype(jnp.float32), (0, Np - cout)).reshape(1, Np)
    t = jnp.pad(bias.astype(jnp.float32), (0, Np - cout)).reshape(1, Np)
    return {'w': b, 's': s, 't': t, 'kh': kh, 'kw': kw}


def prep_conv_bn(w, cin_pad):
    cout = w.shape[-1]
    return prep_conv(w, jnp.full((cout,), BN_SCALE, jnp.float32),
                     jnp.zeros((cout,), jnp.float32), cin_pad)


# ----------------------------------------------------------------------------
# Glue ops (pooling / resize) in plain JAX.
# ----------------------------------------------------------------------------
def maxpool_3x3_s2(x):
    return lax.reduce_window(
        x, jnp.array(-jnp.inf, x.dtype), lax.max,
        window_dimensions=(1, 3, 3, 1),
        window_strides=(1, 2, 2, 1),
        padding=((0, 0), (1, 1), (1, 1), (0, 0)))


def adaptive_avg_pool(x, bins):
    # Matches torch AdaptiveAvgPool2d: window [floor(i*H/b), ceil((i+1)*H/b)).
    n, h, w, c = x.shape
    xf = x.astype(jnp.float32)
    rows = []
    for i in range(bins):
        h0 = (i * h) // bins
        h1 = -((-(i + 1) * h) // bins)
        cols = []
        for j in range(bins):
            w0 = (j * w) // bins
            w1 = -((-(j + 1) * w) // bins)
            cols.append(jnp.mean(xf[:, h0:h1, w0:w1, :], axis=(1, 2)))
        rows.append(jnp.stack(cols, axis=1))
    return jnp.stack(rows, axis=1).astype(jnp.bfloat16)  # (n, bins, bins, c)


def bilinear_resize(x, oh, ow, out_dtype=None):
    # F.interpolate(mode='bilinear', align_corners=True)
    n, h, w, c = x.shape
    if out_dtype is None:
        out_dtype = x.dtype

    def src(o, size):
        if o == 1 or size == 1:
            return np.zeros((o,), np.float32)
        return np.arange(o, dtype=np.float32) * (size - 1) / (o - 1)

    hy = src(oh, h)
    wx = src(ow, w)
    h0 = np.floor(hy).astype(np.int32)
    h1 = np.minimum(h0 + 1, h - 1)
    w0 = np.floor(wx).astype(np.int32)
    w1 = np.minimum(w0 + 1, w - 1)
    dh = jnp.asarray((hy - h0).reshape(1, oh, 1, 1))
    dw = jnp.asarray((wx - w0).reshape(1, 1, ow, 1))
    x00 = x[:, h0][:, :, w0]
    x01 = x[:, h0][:, :, w1]
    x10 = x[:, h1][:, :, w0]
    x11 = x[:, h1][:, :, w1]
    top = x00 * (1.0 - dw) + x01 * dw
    bot = x10 * (1.0 - dw) + x11 * dw
    return (top * (1.0 - dh) + bot * dh).astype(out_dtype)


def bottleneck(x, p, stride, dilation, has_ds):
    out = conv(x, p['w1'], relu=True)
    out = conv(out, p['w2'], stride=stride, pad=dilation,
               dilation=dilation, relu=True)
    if has_ds:
        identity = conv(x, p['wd'], stride=stride, relu=False)
    else:
        identity = x
    # residual add + final ReLU fused into the w3 matmul epilogue
    return conv(out, p['w3'], resid=identity, relu=True)


# ----------------------------------------------------------------------------
# Parameter / config construction (synthetic, deterministic kaiming init;
# matches PSPNet.init_weights_: kaiming fan_out for convs, BN gamma=1 beta=0,
# conv biases zero).  Weights are packed for the Pallas matmul at init time.
# ----------------------------------------------------------------------------
def kaiming_conv(key, kh, kw, cin, cout):
    std = math.sqrt(2.0 / (kh * kw * cout))  # fan_out, relu gain
    return jax.random.normal(key, (kh, kw, cin, cout), jnp.float32) * std


def _make_layer(kg, inplanes, planes, blocks, stride, dilate, dilation):
    prev_dilation = dilation
    if dilate:
        dilation *= stride
        stride = 1
    params, cfg = [], []
    has_ds = (stride != 1) or (inplanes != planes * 4)
    in_pad = _pad128(inplanes)
    p_pad = _pad128(planes)
    p = {'w1': prep_conv_bn(kaiming_conv(kg(), 1, 1, inplanes, planes), in_pad),
         'w2': prep_conv_bn(kaiming_conv(kg(), 3, 3, planes, planes), p_pad),
         'w3': prep_conv_bn(kaiming_conv(kg(), 1, 1, planes, planes * 4), p_pad)}
    if has_ds:
        p['wd'] = prep_conv_bn(kaiming_conv(kg(), 1, 1, inplanes, planes * 4),
                               in_pad)
    params.append(p)
    cfg.append((stride, prev_dilation, has_ds))
    inplanes = planes * 4
    in_pad = _pad128(inplanes)
    for _ in range(1, blocks):
        params.append(
            {'w1': prep_conv_bn(kaiming_conv(kg(), 1, 1, inplanes, planes), in_pad),
             'w2': prep_conv_bn(kaiming_conv(kg(), 3, 3, planes, planes), p_pad),
             'w3': prep_conv_bn(kaiming_conv(kg(), 1, 1, planes, planes * 4), p_pad)})
        cfg.append((1, dilation, False))
    return params, cfg, inplanes, dilation


def init_pspnet(key, bins=(1, 2, 3, 6), num_classes=19):
    keys = [key]

    def kg():
        keys[0], sub = jax.random.split(keys[0])
        return sub

    params, cfg = {}, {}
    # network input keeps its raw 3 channels (no 128-padding of RGB)
    params['stem'] = prep_conv_bn(kaiming_conv(kg(), 7, 7, 3, 64), 3)
    inplanes, dilation = 64, 1
    # resnet50 layers; replace_stride_with_dilation=[False, True, True]
    specs = [('layer1', 64, 3, 1, False),
             ('layer2', 128, 4, 2, False),
             ('layer3', 256, 6, 2, True),
             ('layer4', 512, 3, 2, True)]
    for name, planes, blocks, stride, dilate in specs:
        p, c, inplanes, dilation = _make_layer(kg, inplanes, planes, blocks,
                                               stride, dilate, dilation)
        params[name] = p
        cfg[name] = c
    # Pyramid pooling module: 1x1 conv 2048 -> 512 per bin
    params['ppm'] = [prep_conv_bn(kaiming_conv(kg(), 1, 1, inplanes, 512),
                                  _pad128(inplanes)) for _ in bins]
    # main classification head
    head_in = inplanes + 512 * len(bins)                       # 4096
    params['head_w1'] = prep_conv_bn(kaiming_conv(kg(), 3, 3, head_in, 512),
                                     _pad128(head_in))
    params['head_w2'] = prep_conv(kaiming_conv(kg(), 1, 1, 512, num_classes),
                                  jnp.ones((num_classes,), jnp.float32),
                                  jnp.zeros((num_classes,), jnp.float32),
                                  _pad128(512))
    cfg['bins'] = tuple(bins)
    cfg['num_classes'] = num_classes
    return params, cfg


# ----------------------------------------------------------------------------
# Full forward (eval mode)
# ----------------------------------------------------------------------------
def pspnet_forward(params, x_nchw, cfg):
    x = jnp.transpose(x_nchw, (0, 2, 3, 1)).astype(jnp.bfloat16)  # NHWC bf16
    h_in, w_in = x.shape[1], x.shape[2]

    # feature extractor: conv7x7/s2 + bn + relu + maxpool3x3/s2
    x = conv(x, params['stem'], stride=2, pad=3, relu=True)
    x = maxpool_3x3_s2(x)

    # resnet layers 1..4 (layer3/4 dilated, stride 1)
    for name in ('layer1', 'layer2', 'layer3', 'layer4'):
        for p, (stride, dil, has_ds) in zip(params[name], cfg[name]):
            x = bottleneck(x, p, stride, dil, has_ds)
        # TODO(synk): layer3 output feeds the aux head in training mode only.

    # Pyramid Pooling Module
    hf, wf = x.shape[1], x.shape[2]
    feats = [x]
    for bi, b in enumerate(cfg['bins']):
        y = adaptive_avg_pool(x, b)
        y = conv(y, params['ppm'][bi], relu=True)          # 1x1 conv+BN+ReLU
        y = bilinear_resize(y, hf, wf, out_dtype=jnp.bfloat16)
        feats.append(y)
    y = jnp.concatenate(feats, axis=-1)                    # 2048 + 4*512 = 4096

    # main classification head (Dropout == identity in eval)
    y = conv(y, params['head_w1'], pad=1, relu=True)
    y = conv(y, params['head_w2'], relu=False, out_dtype=jnp.float32)
    y = y[..., :cfg['num_classes']]                        # drop channel padding

    y = bilinear_resize(y, h_in, w_in, out_dtype=jnp.float32)
    return [jnp.transpose(y, (0, 3, 1, 2))]                # NCHW, like torch


if __name__ == "__main__":
    root = jax.random.PRNGKey(0)
    k_x, k_p = jax.random.split(root)
    x = jax.random.normal(k_x, (2, 3, 32, 32), jnp.float32)    # NCHW input
    params, cfg = init_pspnet(k_p, bins=(1, 2, 3, 6), num_classes=19)

    outs = pspnet_forward(params, x, cfg)
    outs = [jax.block_until_ready(o) for o in outs]

    assert outs[0].shape == (2, 19, 32, 32), outs[0].shape
    assert outs[0].dtype == jnp.float32
    assert bool(jnp.all(jnp.isfinite(outs[0])))
    print("KERNEL_OK")
</pallas_src>

<mosaic_0001>
module attributes {stable_mosaic.version = 11 : i64} {
  func.func @_mm_affine_kernel(%arg0: i32, %arg1: i32, %arg2: i32, %arg3: memref<256x256xbf16, #tpu.memory_space<vmem>>, %arg4: memref<256x128xbf16, #tpu.memory_space<vmem>>, %arg5: memref<1x128xf32, #tpu.memory_space<vmem>>, %arg6: memref<1x128xf32, #tpu.memory_space<vmem>>, %arg7: memref<256x128xbf16, #tpu.memory_space<vmem>>, %arg8: memref<256x128xf32, #tpu.memory_space<vmem>>) attributes {dimension_semantics = [#tpu.dimension_semantics<parallel>, #tpu.dimension_semantics<parallel>, #tpu.dimension_semantics<arbitrary>], iteration_bounds = array<i64: 2, 1, 1>, scalar_prefetch = 0 : i64, scratch_operands = 1 : i64, tpu.core_type = #tpu.core_type<tc>, window_params = [{transform_indices = @transform_0, window_bounds = array<i64: 256, 256>}, {transform_indices = @transform_1, window_bounds = array<i64: 256, 128>}, {transform_indices = @transform_2, window_bounds = array<i64: 1, 128>}, {transform_indices = @transform_3, window_bounds = array<i64: 1, 128>}, {transform_indices = @transform_4, window_bounds = array<i64: 256, 128>}]} {
    %c0_i32 = arith.constant 0 : i32
    %0 = arith.cmpi eq, %arg2, %c0_i32 : i32
    %1 = arith.extui %0 : i1 to i32
    %c0_i32_0 = arith.constant 0 : i32
    %2 = arith.cmpi ne, %1, %c0_i32_0 : i32
    scf.if %2 {
      %cst_10 = arith.constant 0.000000e+00 : f32
      %12 = vector.broadcast %cst_10 : f32 to vector<256x128xf32>
      %c0_11 = arith.constant 0 : index
      %c0_12 = arith.constant 0 : index
      %13 = vector.load %arg8[%c0_11, %c0_12] : memref<256x128xf32, #tpu.memory_space<vmem>>, vector<256x128xf32>
      tpu.vector_store %arg8[%c0_11, %c0_12], %12 {strides = array<i32>} : memref<256x128xf32, #tpu.memory_space<vmem>>, vector<256x128xf32>,
    } else {
    }
    %c0 = arith.constant 0 : index
    %c0_1 = arith.constant 0 : index
    %3 = vector.load %arg8[%c0, %c0_1] : memref<256x128xf32, #tpu.memory_space<vmem>>, vector<256x128xf32>
    %c0_2 = arith.constant 0 : index
    %c0_3 = arith.constant 0 : index
    %4 = vector.load %arg3[%c0_2, %c0_3] : memref<256x256xbf16, #tpu.memory_space<vmem>>, vector<256x256xbf16>
    %c0_4 = arith.constant 0 : index
    %c0_5 = arith.constant 0 : index
    %5 = vector.load %arg4[%c0_4, %c0_5] : memref<256x128xbf16, #tpu.memory_space<vmem>>, vector<256x128xbf16>
    %cst = arith.constant dense<0.000000e+00> : vector<256x128xf32>
    %6 = tpu.matmul %4, %5, %cst {dimension_numbers = #tpu.dot_dimension_numbers<[1], [0], [0], [1], [0, 0, 1, 1], [], []>} : vector<256x256xbf16>, vector<256x128xbf16>, vector<256x128xf32> -> vector<256x128xf32>
    %7 = arith.addf %3, %6 : vector<256x128xf32>
    %c0_6 = arith.constant 0 : index
    %c0_7 = arith.constant 0 : index
    %8 = vector.load %arg8[%c0_6, %c0_7] : memref<256x128xf32, #tpu.memory_space<vmem>>, vector<256x128xf32>
    tpu.vector_store %arg8[%c0_6, %c0_7], %7 {strides = array<i32>} : memref<256x128xf32, #tpu.memory_space<vmem>>, vector<256x128xf32>,
    %c0_i32_8 = arith.constant 0 : i32
    %9 = arith.cmpi eq, %arg2, %c0_i32_8 : i32
    %10 = arith.extui %9 : i1 to i32
    %c0_i32_9 = arith.constant 0 : i32
    %11 = arith.cmpi ne, %10, %c0_i32_9 : i32
    scf.if %11 {
      %c0_10 = arith.constant 0 : index
      %c0_11 = arith.constant 0 : index
      %12 = vector.load %arg8[%c0_10, %c0_11] : memref<256x128xf32, #tpu.memory_space<vmem>>, vector<256x128xf32>
      %c0_12 = arith.constant 0 : index
      %c0_13 = arith.constant 0 : index
      %13 = vector.load %arg5[%c0_12, %c0_13] : memref<1x128xf32, #tpu.memory_space<vmem>>, vector<1x128xf32>
      %14 = vector.broadcast %13 : vector<1x128xf32> to vector<256x128xf32>
      %15 = arith.mulf %12, %14 : vector<256x128xf32>
      %c0_14 = arith.constant 0 : index
      %c0_15 = arith.constant 0 : index
      %16 = vector.load %arg6[%c0_14, %c0_15] : memref<1x128xf32, #tpu.memory_space<vmem>>, vector<1x128xf32>
      %17 = vector.broadcast %16 : vector<1x128xf32> to vector<256x128xf32>
      %18 = arith.addf %15, %17 : vector<256x128xf32>
      %cst_16 = arith.constant 0.000000e+00 : f32
      %19 = vector.broadcast %cst_16 : f32 to vector<256x128xf32>
      %20 = arith.maximumf %18, %19 : vector<256x128xf32>
      %21 = arith.truncf %20 : vector<256x128xf32> to vector<256x128xbf16>
      %c0_17 = arith.constant 0 : index
      %c0_18 = arith.constant 0 : index
      %22 = vector.load %arg7[%c0_17, %c0_18] : memref<256x128xbf16, #tpu.memory_space<vmem>>, vector<256x128xbf16>
      tpu.vector_store %arg7[%c0_17, %c0_18], %21 {strides = array<i32>} : memref<256x128xbf16, #tpu.memory_space<vmem>>, vector<256x128xbf16>,
    } else {
    }
    return
  }
  func.func @transform_0(%arg0: i32, %arg1: i32, %arg2: i32) -> (i32, i32) {
    %c0_i32 = arith.constant 0 : i32
    return %arg0, %arg2 : i32, i32
  }
  func.func @transform_1(%arg0: i32, %arg1: i32, %arg2: i32) -> (i32, i32) {
    %c0_i32 = arith.constant 0 : i32
    return %arg2, %arg1 : i32, i32
  }
  func.func @transform_2(%arg0: i32, %arg1: i32, %arg2: i32) -> (i32, i32) {
    %c0_i32 = arith.constant 0 : i32
    %c0_i32_0 = arith.constant 0 : i32
    return %c0_i32, %arg1 : i32, i32
  }
  func.func @transform_3(%arg0: i32, %arg1: i32, %arg2: i32) -> (i32, i32) {
    %c0_i32 = arith.constant 0 : i32
    %c0_i32_0 = arith.constant 0 : i32
    return %c0_i32, %arg1 : i32, i32
  }
  func.func @transform_4(%arg0: i32, %arg1: i32, %arg2: i32) -> (i32, i32) {
    %c0_i32 = arith.constant 0 : i32
    return %arg0, %arg1 : i32, i32
  }
}

</mosaic_0001>

<bundles_post_ra>
// kernel: _matmul_affine_impl.1
= control target key start
LH: loop header
LB: loop body
LE: loop exit
PB: predicated region body
PF: predicated region fallthrough
CT: control target
= control target key end

     0   :  { %9 = vsyncpa [#allocation4], 0  ;;  %s2235_s0 = inlined_call_operand.vmem [shape: bf16[512,256], index: 0, kind: input, shape index: {}]   ;;  %s2236_s1 = inlined_call_operand.vmem [shape: bf16[256,128], index: 1, kind: input, shape index: {}]   ;;  %s2237_s2 = inlined_call_operand.vmem [shape: f32[1,128], index: 2, kind: input, shape index: {}]   ;;  %s2238_s3 = inlined_call_operand.vmem [shape: f32[1,128], index: 3, kind: input, shape index: {}]   ;;  %s2239_s4 = inlined_call_operand.hbm [shape: bf16[512,128], index: 4, kind: output, shape index: {}]  }
   0x1   :  { %11 = vsyncpa [#allocation4 + $0x1], 0  ;;  %s1942_s15 = smov 0   ;;  %s1944_s16 = smov 0  }
   0x2   :  { %s1946_s17 = smov 0   ;;  %s1948_s18 = smov 0  }
   0x3   :  { %s1950_s19 = smov 0   ;;  %s1952_s20 = smov 0  }
   0x4 LB: > { %s1357_s21 = sadd.s32 4294967295, %s1912_s20   ;;  %s1358_s22 = sadd.s32 4294967294, %s1912_s20   ;;  %s1912_s20 = sphi %s1952_s20, %s17_s20   ;;  %s1908_s19 = sphi %s1950_s19, %s2246_s19   ;;  %s1904_s18 = sphi %s1948_s18, %s2245_s18   ;;  %s1900_s17 = sphi %s1946_s17, %s2244_s17   ;;  %s1896_s16 = sphi %s1944_s16, %s2243_s16   ;;  %s1892_s15 = sphi %s1942_s15, %s2242_s15  }
   0x5   : > { %s36_s23 = sadd.s32 1, %s1908_s19  ;;  %s153_s24 = sadd.s32 1, %s1900_s17 }
   0x6   : > { %p38_p0 = scmp.ge.s32.totalorder %s36_s23, 2  ;;  %p163_p1 = scmp.ne.s32.totalorder %s1900_s17, %s1896_s16 }
   0x7   : > { %p164_p2 = scmp.eq.s32.totalorder %s1357_s21, 1  ;;  %p169_p3 = scmp.ne.s32.totalorder %s1896_s16, %s1892_s15 }
   0x8   : > { %s2248_s23 = smov (%p38_p0, %s36_s23), 0  ;;  %p170_p5 = scmp.eq.s32.totalorder %s1358_s22, 1 }
   0x9   : > { %p1982_p4 = por %p164_p2, %p163_p1  ;;  %s148_s26 = ssub.s32 %s1908_s19, %s2248_s23 }
   0xa   : > { %p1364_p6 = scmp.ge.s32.totalorder %s1912_s20, 1  ;;  %p151_p7 = scmp.eq.s32.totalorder %s148_s26, 0 }
   0xb   : > { %p1989_p8 = por %p170_p5, %p169_p3  ;;  %p227_p9 = scmp.lt.s32.totalorder %s1912_s20, 3 }
   0xc   : > { %s1995_s28 = scalar_select %p151_p7, %s1900_s17, %s153_s24  }
   0xd   : > { %p228_p10 = pnand %p1364_p6, %p227_p9 }
   0xe   : > { %v1770_v0 = vld [vmem:[%s2236_s1 + $0x40] sm:$0xff] (!%p228_p10)   ;;  %s1366_s5 = sshll.u32 (!%p228_p10), %s1904_s18, 5  ;;  %v1772_v2 = vld [vmem:[%s2236_s1 + $0x48] sm:$0xff] (!%p228_p10)   ;;  %v1774_v4 = vld [vmem:[%s2236_s1 + $0x50] sm:$0xff] (!%p228_p10)   ;;  %s1489_s21 = sshll.u32 (!%p228_p10), %s1904_s18, 11 }
   0xf   : > { %231 = sbr.rel (%p228_p10) target bundleno = 344 (0x158), region = 36  ;;  %v1771_v1 = vld [vmem:[%s2236_s1] sm:$0xff] (!%p228_p10)   ;;  %1585 = vmatprep.subr.bf16.mxu0 (!%p228_p10), %v1770_v0  ;;  %1697 = vmatprep.subr.bf16.mxu1 (!%p228_p10), %v1770_v0  ;;  %v1773_v3 = vld [vmem:[%s2236_s1 + $0x8] sm:$0xff] (!%p228_p10)   ;;  %p274_p11 = scmp.lt.s32.totalorder (!%p228_p10), %s1366_s5, 63  ;;  %v1775_v5 = vld [vmem:[%s2236_s1 + $0x10] sm:$0xff] (!%p228_p10)  }
  0x10   : > { %1586 = vmatpush3.bf16.msra.mxu0 (!%p228_p10), %v1771_v1  ;;  %1705 = vmatpush3.bf16.msra.mxu1 (!%p228_p10), %v1771_v1  ;;  %v1776_v6 = vld [vmem:[%s2236_s1 + $0x58] sm:$0xff] (!%p228_p10)   ;;  %v1778_v8 = vld [vmem:[%s2236_s1 + $0x60] sm:$0xff] (!%p228_p10)   ;;  %v1780_v10 = vld [vmem:[%s2236_s1 + $0x68] sm:$0xff] (!%p228_p10)   ;;  %s2181_s29 = scalar_lea.hbm (!%p228_p10), %s2239_s4, %s1489_s21  ;;  %s1914_s6 = smov (!%p228_p10), [#allocation3]  }
  0x11   : > { %1587 = vmatprep.subr.bf16.mxu0 (!%p228_p10), %v1772_v2  ;;  %1698 = vmatprep.subr.bf16.mxu1 (!%p228_p10), %v1772_v2  ;;  %v1777_v7 = vld [vmem:[%s2236_s1 + $0x18] sm:$0xff] (!%p228_p10)   ;;  %v1779_v9 = vld [vmem:[%s2236_s1 + $0x20] sm:$0xff] (!%p228_p10)   ;;  %v1781_v13 = vld [vmem:[%s2236_s1 + $0x28] sm:$0xff] (!%p228_p10)   ;;  %s1838_s7 = sshll.u32 (!%p228_p10), %s1914_s6, 4  ;;  %s1839_s7 = int_to_ptr.vmem [resolvable:$false] %s1838_s7 }
  0x12   : > { %v1782_v14 = vld [vmem:[%s2236_s1 + $0x70] sm:$0xff] (!%p228_p10)   ;;  %v1784_v16 = vld [vmem:[%s2236_s1 + $0x78] sm:$0xff] (!%p228_p10)   ;;  %v2086_v51 = vld [vmem:[%s2237_s2] ss:$0 sm:$0xff] (!%p228_p10)  ;;  %s1840_s8 = scalar_lea.vmem (!%p228_p10), %s1839_s7, 4096 }
  0x13   : > { %v1783_v15 = vld [vmem:[%s2236_s1 + $0x30] sm:$0xff] (!%p228_p10)   ;;  %v1785_v17 = vld [vmem:[%s2236_s1 + $0x38] sm:$0xff] (!%p228_p10)   ;;  %v2091_v57 = vld [vmem:[%s2238_s3] ss:$0 sm:$0xff] (!%p228_p10) }
  0x14   : > { %1588 = vmatpush3.bf16.msra.mxu0 (!%p228_p10), %v1773_v3  ;;  %1706 = vmatpush3.bf16.msra.mxu1 (!%p228_p10), %v1773_v3 }
  0x15   : > { %1589 = vmatprep.subr.bf16.mxu0 (!%p228_p10), %v1774_v4  ;;  %1699 = vmatprep.subr.bf16.mxu1 (!%p228_p10), %v1774_v4 }
  0x16   : > { %s2250_s5 = smov (!%p274_p11, %s1366_s5), 63 }
  0x17   : > { %s1456_s30 = sshll.u32 %s2250_s5, 3 }
  0x18   : > { %1590 = vmatpush3.bf16.msra.mxu0 %v1775_v5  ;;  %1707 = vmatpush3.bf16.msra.mxu1 %v1775_v5  ;;  %s2028_s10 = scalar_lea.vmem %s2235_s0, %s1456_s30 }
  0x19   : > { %1591 = vmatprep.subr.bf16.mxu0 %v1776_v6  ;;  %1700 = vmatprep.subr.bf16.mxu1 %v1776_v6  ;;  %v1788_v11 = vld [vmem:[%s2028_s10 + $0x4] ss:$8 sps:$4 sm:$0xff]   ;;  %v1786_v18 = vld [vmem:[%s2028_s10] ss:$8 sps:$4 sm:$0xff]   ;;  %v1792_v20 = vld [vmem:[%s2028_s10 + $0x14] ss:$8 sps:$4 sm:$0xff]  }
  0x1a   : > { %v1791_v12 = vld [vmem:[%s2028_s10 + $0x84] ss:$8 sps:$4 sm:$0xff]   ;;  %721 = vmatprep.mubr.bf16.mxu0 %v1788_v11  ;;  %v1789_v19 = vld [vmem:[%s2028_s10 + $0x80] ss:$8 sps:$4 sm:$0xff]   ;;  %v1794_v21 = vld [vmem:[%s2028_s10 + $0x94] ss:$8 sps:$4 sm:$0xff]  }
  0x1b   : > { %785 = vmatprep.mubr.bf16.mxu1 %v1791_v12  ;;  %v1796_v22 = vld [vmem:[%s2028_s10 + $0x10] ss:$8 sps:$4 sm:$0xff]   ;;  %v1798_v24 = vld [vmem:[%s2028_s10 + $0x24] ss:$8 sps:$4 sm:$0xff]   ;;  %v1802_v26 = vld [vmem:[%s2028_s10 + $0x20] ss:$8 sps:$4 sm:$0xff]  }
  0x1c   : > { %1592 = vmatpush3.bf16.msra.mxu0 %v1777_v7  ;;  %1708 = vmatpush3.bf16.msra.mxu1 %v1777_v7  ;;  %v1797_v23 = vld [vmem:[%s2028_s10 + $0x90] ss:$8 sps:$4 sm:$0xff]   ;;  %v1800_v25 = vld [vmem:[%s2028_s10 + $0xa4] ss:$8 sps:$4 sm:$0xff]   ;;  %v1803_v27 = vld [vmem:[%s2028_s10 + $0xa0] ss:$8 sps:$4 sm:$0xff]  }
  0x1d   : > { %1593 = vmatprep.subr.bf16.mxu0 %v1778_v8  ;;  %1701 = vmatprep.subr.bf16.mxu1 %v1778_v8  ;;  %v1804_v28 = vld [vmem:[%s2028_s10 + $0x34] ss:$8 sps:$4 sm:$0xff]   ;;  %v1808_v30 = vld [vmem:[%s2028_s10 + $0x30] ss:$8 sps:$4 sm:$0xff]   ;;  %v1810_v32 = vld [vmem:[%s2028_s10 + $0x44] ss:$8 sps:$4 sm:$0xff]  }
  0x1e   : > { %v1806_v29 = vld [vmem:[%s2028_s10 + $0xb4] ss:$8 sps:$4 sm:$0xff]   ;;  %v1809_v31 = vld [vmem:[%s2028_s10 + $0xb0] ss:$8 sps:$4 sm:$0xff]   ;;  %v1812_v33 = vld [vmem:[%s2028_s10 + $0xc4] ss:$8 sps:$4 sm:$0xff]  }
  0x1f   : > { %v1814_v34 = vld [vmem:[%s2028_s10 + $0x40] ss:$8 sps:$4 sm:$0xff]   ;;  %v1816_v36 = vld [vmem:[%s2028_s10 + $0x54] ss:$8 sps:$4 sm:$0xff]   ;;  %v1820_v38 = vld [vmem:[%s2028_s10 + $0x50] ss:$8 sps:$4 sm:$0xff]  }
  0x20   : > { %1594 = vmatpush3.bf16.msra.mxu0 %v1779_v9  ;;  %1709 = vmatpush3.bf16.msra.mxu1 %v1779_v9  ;;  %v1815_v35 = vld [vmem:[%s2028_s10 + $0xc0] ss:$8 sps:$4 sm:$0xff]   ;;  %v1818_v37 = vld [vmem:[%s2028_s10 + $0xd4] ss:$8 sps:$4 sm:$0xff]   ;;  %v1821_v39 = vld [vmem:[%s2028_s10 + $0xd0] ss:$8 sps:$4 sm:$0xff]  }
  0x21   : > { %1595 = vmatprep.subr.bf16.mxu0 %v1780_v10  ;;  %1702 = vmatprep.subr.bf16.mxu1 %v1780_v10  ;;  %v1822_v40 = vld [vmem:[%s2028_s10 + $0x64] ss:$8 sps:$4 sm:$0xff]   ;;  %v1826_v42 = vld [vmem:[%s2028_s10 + $0x60] ss:$8 sps:$4 sm:$0xff]   ;;  %v1828_v44 = vld [vmem:[%s2028_s10 + $0x74] ss:$8 sps:$4 sm:$0xff]  }
  0x22   : > { %v1824_v41 = vld [vmem:[%s2028_s10 + $0xe4] ss:$8 sps:$4 sm:$0xff]   ;;  %v1827_v43 = vld [vmem:[%s2028_s10 + $0xe0] ss:$8 sps:$4 sm:$0xff]   ;;  %v1830_v45 = vld [vmem:[%s2028_s10 + $0xf4] ss:$8 sps:$4 sm:$0xff]  }
  0x23   : > { %v1832_v46 = vld [vmem:[%s2028_s10 + $0x70] ss:$8 sps:$4 sm:$0xff]  }
  0x24   : > { %1596 = vmatpush3.bf16.msra.mxu0 %v1781_v13  ;;  %1710 = vmatpush3.bf16.msra.mxu1 %v1781_v13  ;;  %v1833_v47 = vld [vmem:[%s2028_s10 + $0xf0] ss:$8 sps:$4 sm:$0xff]   ;;  %s269_s10 = sand.u32 1, %s1896_s16  }
  0x25   : > { %1597 = vmatprep.subr.bf16.mxu0 %v1782_v14  ;;  %1703 = vmatprep.subr.bf16.mxu1 %v1782_v14  ;;  %s1365_s13 = sshll.u32 %s269_s10, 7  ;;  %s2189_s18 = scalar_lea.sflag [#allocation4], %s269_s10 }
  0x26   : > { %s2106_s14 = scalar_lea.vmem [#allocation3], %s1365_s13 }
  0x27   : > { %s1234_s22 = sshll.u32 %s2106_s14, 4  ;;  %s2183_s22 = int_to_ptr.vmem [resolvable:$true] %s1234_s22 }
  0x28   : > { %1598 = vmatpush3.bf16.msra.mxu0 %v1783_v15  ;;  %1711 = vmatpush3.bf16.msra.mxu1 %v1783_v15  ;;  %s1834_s30 = scalar_lea.vmem %s2183_s22, 2048  ;;  %p1841_p1 = scmp.lt.s32.totalorder %s2183_s22, %s1839_s7 }
  0x29   : > { %1599 = vmatprep.subr.bf16.mxu0 %v1784_v16  ;;  %1704 = vmatprep.subr.bf16.mxu1 %v1784_v16  ;;  %p1835_p12 = scmp.ne.s32.totalorder %s2183_s22, %s1834_s30  ;;  %p1842_p2 = scmp.lt.s32.totalorder %s1840_s8, %s1834_s30 }
  0x2b   : > { %p1836_p13 = pnand %p1835_p12, %p1982_p4  ;;  %p1843_p3 = por %p1842_p2, %p1841_p1 }
  0x2c   : > { %1600 = vmatpush3.bf16.msra.mxu0 %v1785_v17  ;;  %1712 = vmatpush3.bf16.msra.mxu1 %v1785_v17 }
  0x2d   : > { %p1837_p0 = pneg %p1836_p13 }
  0x2f   : > { %722 = vmatmul.mubr.bf16.vlgmr.msra.gmra.mrb[0].mxu0 %v1786_v18  ;;  %786 = vmatmul.mubr.bf16.vlgmr.msra.gmra.mrb[0].mxu1 %v1789_v19  ;;  %p1844_p5 = pnand %p1843_p3, %p1837_p0 }
  0x30   : > { %729 = vmatprep.mubr.bf16.mxu0 %v1792_v20  ;;  %793 = vmatprep.mubr.bf16.mxu1 %v1794_v21 }
  0x37   : > { %730 = vmatmul.mubr.bf16.gmra.mrb[4].mxu0 %v1796_v22  ;;  %794 = vmatmul.mubr.bf16.gmra.mrb[4].mxu1 %v1797_v23 }
  0x38   : > { %737 = vmatprep.mubr.bf16.mxu0 %v1798_v24  ;;  %801 = vmatprep.mubr.bf16.mxu1 %v1800_v25 }
  0x3f   : > { %738 = vmatmul.mubr.bf16.gmra.mrb[8].mxu0 %v1802_v26  ;;  %802 = vmatmul.mubr.bf16.gmra.mrb[8].mxu1 %v1803_v27 }
  0x40   : > { %745 = vmatprep.mubr.bf16.mxu0 %v1804_v28  ;;  %809 = vmatprep.mubr.bf16.mxu1 %v1806_v29 }
  0x47   : > { %746 = vmatmul.mubr.bf16.gmra.mrb[12].mxu0 %v1808_v30  ;;  %810 = vmatmul.mubr.bf16.gmra.mrb[12].mxu1 %v1809_v31 }
  0x48   : > { %753 = vmatprep.mubr.bf16.mxu0 %v1810_v32  ;;  %817 = vmatprep.mubr.bf16.mxu1 %v1812_v33 }
  0x4f   : > { %754 = vmatmul.mubr.bf16.gmra.mrb[16].mxu0 %v1814_v34  ;;  %818 = vmatmul.mubr.bf16.gmra.mrb[16].mxu1 %v1815_v35 }
  0x50   : > { %761 = vmatprep.mubr.bf16.mxu0 %v1816_v36  ;;  %825 = vmatprep.mubr.bf16.mxu1 %v1818_v37 }
  0x57   : > { %762 = vmatmul.mubr.bf16.gmra.mrb[20].mxu0 %v1820_v38  ;;  %826 = vmatmul.mubr.bf16.gmra.mrb[20].mxu1 %v1821_v39 }
  0x58   : > { %769 = vmatprep.mubr.bf16.mxu0 %v1822_v40  ;;  %833 = vmatprep.mubr.bf16.mxu1 %v1824_v41 }
  0x5f   : > { %770 = vmatmul.mubr.bf16.gmra.mrb[24].mxu0 %v1826_v42  ;;  %834 = vmatmul.mubr.bf16.gmra.mrb[24].mxu1 %v1827_v43 }
  0x60   : > { %777 = vmatprep.mubr.bf16.mxu0 %v1828_v44  ;;  %841 = vmatprep.mubr.bf16.mxu1 %v1830_v45 }
  0x67   : > { %778 = vmatmul.mubr.bf16.gmra.mrb[28].mxu0 %v1832_v46  ;;  %842 = vmatmul.mubr.bf16.gmra.mrb[28].mxu1 %v1833_v47 }
 0x102   : > { %v1601_v48 = vpop.f32.mrb[0].mxu0  ;;  %v1649_v49 = vpop.f32.mrb[0].mxu1 }
 0x103   : > { %v1602_v50 = vpop.f32.mrb[1].mxu0  ;;  %v1650_v52 = vpop.f32.mrb[1].mxu1 }
 0x104   : > { %v1603_v53 = vadd.f32 %v1602_v50, %v1601_v48  ;;  %v1651_v54 = vadd.f32 %v1650_v52, %v1649_v49  ;;  %v1604_v55 = vpop.f32.mrb[2].mxu0  ;;  %v1652_v56 = vpop.f32.mrb[2].mxu1 }
 0x105   : > { %v1605_v58 = vpop.f32.mrb[3].mxu0  ;;  %v1653_v59 = vpop.f32.mrb[3].mxu1 }
 0x106   : > { %v956_v60 = vmul.f32 %v1603_v53, %v2086_v51  ;;  %v972_v61 = vmul.f32 %v1651_v54, %v2086_v51  ;;  %v1606_v62 = vadd.f32 %v1605_v58, %v1604_v55  ;;  %v1654_v63 = vadd.f32 %v1653_v59, %v1652_v56 }
 0x108   : > { %v995_v0 = vadd.f32 %v2091_v57, %v956_v60  ;;  %v1011_v1 = vadd.f32 %v2091_v57, %v972_v61  ;;  %v957_v2 = vmul.f32 %v1606_v62, %v2086_v51  ;;  %v973_v3 = vmul.f32 %v1654_v63, %v2086_v51 }
 0x10a   : > { %v996_v4 = vadd.f32 %v2091_v57, %v957_v2  ;;  %v1012_v5 = vadd.f32 %v2091_v57, %v973_v3  ;;  %v1607_v6 = vpop.f32.mrb[4].mxu0  ;;  %v1655_v7 = vpop.f32.mrb[4].mxu1  ;;  %v1027_v8 = vmax.f32 %v995_v0, 0.0  ;;  %v1043_v9 = vmax.f32 %v1011_v1, 0.0 }
 0x10b   : > { %v1608_v10 = vpop.f32.mrb[5].mxu0  ;;  %v1656_v11 = vpop.f32.mrb[5].mxu1 }
 0x10c   : > { %v1028_v12 = vmax.f32 %v996_v4, 0.0  ;;  %v1044_v13 = vmax.f32 %v1012_v5, 0.0  ;;  %v1609_v14 = vadd.f32 %v1608_v10, %v1607_v6  ;;  %v1657_v15 = vadd.f32 %v1656_v11, %v1655_v7  ;;  %v1610_v16 = vpop.f32.mrb[6].mxu0  ;;  %v1658_v17 = vpop.f32.mrb[6].mxu1 }
 0x10d   : > { %v1611_v18 = vpop.f32.mrb[7].mxu0  ;;  %v1659_v19 = vpop.f32.mrb[7].mxu1 }
 0x10e   : > { %v1493_v20 = vpack.c.bf16 %v1028_v12, %v1027_v8  ;;  %v1533_v21 = vpack.c.bf16 %v1044_v13, %v1043_v9  ;;  %v958_v22 = vmul.f32 %v1609_v14, %v2086_v51  ;;  %v974_v23 = vmul.f32 %v1657_v15, %v2086_v51 }
 0x10f   : > { %v1612_v24 = vadd.f32 %v1611_v18, %v1610_v16  ;;  %v1660_v25 = vadd.f32 %v1659_v19, %v1658_v17 }
 0x110   : > { %1494 = vst [vmem:[%s2106_s14] sm:$0xff] %v1493_v20   ;;  %1577 = vst [vmem:[%s2106_s14 + $0x40] sm:$0xff] %v1533_v21   ;;  %v997_v26 = vadd.f32 %v2091_v57, %v958_v22  ;;  %v1013_v27 = vadd.f32 %v2091_v57, %v974_v23 }
 0x111   : > { %v959_v28 = vmul.f32 %v1612_v24, %v2086_v51  ;;  %v975_v29 = vmul.f32 %v1660_v25, %v2086_v51 }
 0x112   : > { %v1613_v30 = vpop.f32.mrb[8].mxu0  ;;  %v1661_v31 = vpop.f32.mrb[8].mxu1  ;;  %v1029_v40 = vmax.f32 %v997_v26, 0.0  ;;  %v1045_v41 = vmax.f32 %v1013_v27, 0.0 }
 0x113   : > { %v998_v32 = vadd.f32 %v2091_v57, %v959_v28  ;;  %v1014_v33 = vadd.f32 %v2091_v57, %v975_v29  ;;  %v1614_v34 = vpop.f32.mrb[9].mxu0  ;;  %v1662_v35 = vpop.f32.mrb[9].mxu1 }
 0x114   : > { %v1615_v36 = vadd.f32 %v1614_v34, %v1613_v30  ;;  %v1663_v37 = vadd.f32 %v1662_v35, %v1661_v31  ;;  %v1616_v38 = vpop.f32.mrb[10].mxu0  ;;  %v1664_v39 = vpop.f32.mrb[10].mxu1 }
 0x115   : > { %v1030_v42 = vmax.f32 %v998_v32, 0.0  ;;  %v1046_v43 = vmax.f32 %v1014_v33, 0.0  ;;  %v1617_v44 = vpop.f32.mrb[11].mxu0  ;;  %v1665_v45 = vpop.f32.mrb[11].mxu1 }
 0x116   : > { %v960_v46 = vmul.f32 %v1615_v36, %v2086_v51  ;;  %v976_v47 = vmul.f32 %v1663_v37, %v2086_v51  ;;  %v1618_v48 = vadd.f32 %v1617_v44, %v1616_v38  ;;  %v1666_v49 = vadd.f32 %v1665_v45, %v1664_v39 }
 0x117   : > { %v1498_v50 = vpack.c.bf16 %v1030_v42, %v1029_v40  ;;  %v1538_v52 = vpack.c.bf16 %v1046_v43, %v1045_v41 }
 0x118   : > { %v999_v53 = vadd.f32 %v2091_v57, %v960_v46  ;;  %v1015_v54 = vadd.f32 %v2091_v57, %v976_v47  ;;  %v961_v55 = vmul.f32 %v1618_v48, %v2086_v51  ;;  %v977_v56 = vmul.f32 %v1666_v49, %v2086_v51 }
 0x119   : > { %1570 = vst [vmem:[%s2106_s14 + $0x8] sm:$0xff] %v1498_v50   ;;  %1578 = vst [vmem:[%s2106_s14 + $0x48] sm:$0xff] %v1538_v52  }
 0x11a   : > { %v1000_v58 = vadd.f32 %v2091_v57, %v961_v55  ;;  %v1016_v59 = vadd.f32 %v2091_v57, %v977_v56  ;;  %v1619_v60 = vpop.f32.mrb[12].mxu0  ;;  %v1667_v61 = vpop.f32.mrb[12].mxu1  ;;  %v1031_v62 = vmax.f32 %v999_v53, 0.0  ;;  %v1047_v63 = vmax.f32 %v1015_v54, 0.0 }
 0x11b   : > { %v1620_v0 = vpop.f32.mrb[13].mxu0  ;;  %v1668_v1 = vpop.f32.mrb[13].mxu1 }
 0x11c   : > { %v1032_v2 = vmax.f32 %v1000_v58, 0.0  ;;  %v1048_v3 = vmax.f32 %v1016_v59, 0.0  ;;  %v1621_v4 = vadd.f32 %v1620_v0, %v1619_v60  ;;  %v1669_v5 = vadd.f32 %v1668_v1, %v1667_v61  ;;  %v1622_v6 = vpop.f32.mrb[14].mxu0  ;;  %v1670_v7 = vpop.f32.mrb[14].mxu1 }
 0x11d   : > { %v1623_v8 = vpop.f32.mrb[15].mxu0  ;;  %v1671_v9 = vpop.f32.mrb[15].mxu1 }
 0x11e   : > { %v1503_v10 = vpack.c.bf16 %v1032_v2, %v1031_v62  ;;  %v1543_v11 = vpack.c.bf16 %v1048_v3, %v1047_v63  ;;  %v962_v12 = vmul.f32 %v1621_v4, %v2086_v51  ;;  %v978_v13 = vmul.f32 %v1669_v5, %v2086_v51 }
 0x11f   : > { %v1624_v14 = vadd.f32 %v1623_v8, %v1622_v6  ;;  %v1672_v15 = vadd.f32 %v1671_v9, %v1670_v7 }
 0x120   : > { %1571 = vst [vmem:[%s2106_s14 + $0x10] sm:$0xff] %v1503_v10   ;;  %1579 = vst [vmem:[%s2106_s14 + $0x50] sm:$0xff] %v1543_v11   ;;  %v1001_v16 = vadd.f32 %v2091_v57, %v962_v12  ;;  %v1017_v17 = vadd.f32 %v2091_v57, %v978_v13 }
 0x121   : > { %v963_v18 = vmul.f32 %v1624_v14, %v2086_v51  ;;  %v979_v19 = vmul.f32 %v1672_v15, %v2086_v51 }
 0x122   : > { %v1625_v20 = vpop.f32.mrb[16].mxu0  ;;  %v1673_v21 = vpop.f32.mrb[16].mxu1  ;;  %v1033_v30 = vmax.f32 %v1001_v16, 0.0  ;;  %v1049_v31 = vmax.f32 %v1017_v17, 0.0 }
 0x123   : > { %v1002_v22 = vadd.f32 %v2091_v57, %v963_v18  ;;  %v1018_v23 = vadd.f32 %v2091_v57, %v979_v19  ;;  %v1626_v24 = vpop.f32.mrb[17].mxu0  ;;  %v1674_v25 = vpop.f32.mrb[17].mxu1 }
 0x124   : > { %v1627_v26 = vadd.f32 %v1626_v24, %v1625_v20  ;;  %v1675_v27 = vadd.f32 %v1674_v25, %v1673_v21  ;;  %v1628_v28 = vpop.f32.mrb[18].mxu0  ;;  %v1676_v29 = vpop.f32.mrb[18].mxu1 }
 0x125   : > { %v1034_v32 = vmax.f32 %v1002_v22, 0.0  ;;  %v1050_v33 = vmax.f32 %v1018_v23, 0.0  ;;  %v1629_v34 = vpop.f32.mrb[19].mxu0  ;;  %v1677_v35 = vpop.f32.mrb[19].mxu1 }
 0x126   : > { %v964_v36 = vmul.f32 %v1627_v26, %v2086_v51  ;;  %v980_v37 = vmul.f32 %v1675_v27, %v2086_v51  ;;  %v1630_v38 = vadd.f32 %v1629_v34, %v1628_v28  ;;  %v1678_v39 = vadd.f32 %v1677_v35, %v1676_v29 }
 0x127   : > { %v1508_v40 = vpack.c.bf16 %v1034_v32, %v1033_v30  ;;  %v1548_v41 = vpack.c.bf16 %v1050_v33, %v1049_v31 }
 0x128   : > { %v1003_v42 = vadd.f32 %v2091_v57, %v964_v36  ;;  %v1019_v43 = vadd.f32 %v2091_v57, %v980_v37  ;;  %v965_v44 = vmul.f32 %v1630_v38, %v2086_v51  ;;  %v981_v45 = vmul.f32 %v1678_v39, %v2086_v51 }
 0x129   : > { %1572 = vst [vmem:[%s2106_s14 + $0x18] sm:$0xff] %v1508_v40   ;;  %1580 = vst [vmem:[%s2106_s14 + $0x58] sm:$0xff] %v1548_v41  }
 0x12a   : > { %v1004_v46 = vadd.f32 %v2091_v57, %v965_v44  ;;  %v1020_v47 = vadd.f32 %v2091_v57, %v981_v45  ;;  %v1631_v48 = vpop.f32.mrb[20].mxu0  ;;  %v1679_v49 = vpop.f32.mrb[20].mxu1  ;;  %v1035_v50 = vmax.f32 %v1003_v42, 0.0  ;;  %v1051_v52 = vmax.f32 %v1019_v43, 0.0 }
 0x12b   : > { %v1632_v53 = vpop.f32.mrb[21].mxu0  ;;  %v1680_v54 = vpop.f32.mrb[21].mxu1 }
 0x12c   : > { %v1036_v55 = vmax.f32 %v1004_v46, 0.0  ;;  %v1052_v56 = vmax.f32 %v1020_v47, 0.0  ;;  %v1633_v58 = vadd.f32 %v1632_v53, %v1631_v48  ;;  %v1681_v59 = vadd.f32 %v1680_v54, %v1679_v49  ;;  %v1634_v60 = vpop.f32.mrb[22].mxu0  ;;  %v1682_v61 = vpop.f32.mrb[22].mxu1 }
 0x12d   : > { %v1635_v62 = vpop.f32.mrb[23].mxu0  ;;  %v1683_v63 = vpop.f32.mrb[23].mxu1 }
 0x12e   : > { %v1513_v0 = vpack.c.bf16 %v1036_v55, %v1035_v50  ;;  %v1553_v1 = vpack.c.bf16 %v1052_v56, %v1051_v52  ;;  %v966_v2 = vmul.f32 %v1633_v58, %v2086_v51  ;;  %v982_v3 = vmul.f32 %v1681_v59, %v2086_v51 }
 0x12f   : > { %v1636_v4 = vadd.f32 %v1635_v62, %v1634_v60  ;;  %v1684_v5 = vadd.f32 %v1683_v63, %v1682_v61 }
 0x130   : > { %1573 = vst [vmem:[%s2106_s14 + $0x20] sm:$0xff] %v1513_v0   ;;  %1581 = vst [vmem:[%s2106_s14 + $0x60] sm:$0xff] %v1553_v1   ;;  %v1005_v6 = vadd.f32 %v2091_v57, %v966_v2  ;;  %v1021_v7 = vadd.f32 %v2091_v57, %v982_v3 }
 0x131   : > { %v967_v8 = vmul.f32 %v1636_v4, %v2086_v51  ;;  %v983_v9 = vmul.f32 %v1684_v5, %v2086_v51 }
 0x132   : > { %v1637_v10 = vpop.f32.mrb[24].mxu0  ;;  %v1685_v11 = vpop.f32.mrb[24].mxu1  ;;  %v1037_v20 = vmax.f32 %v1005_v6, 0.0  ;;  %v1053_v21 = vmax.f32 %v1021_v7, 0.0 }
 0x133   : > { %v1006_v12 = vadd.f32 %v2091_v57, %v967_v8  ;;  %v1022_v13 = vadd.f32 %v2091_v57, %v983_v9  ;;  %v1638_v14 = vpop.f32.mrb[25].mxu0  ;;  %v1686_v15 = vpop.f32.mrb[25].mxu1 }
 0x134   : > { %v1639_v16 = vadd.f32 %v1638_v14, %v1637_v10  ;;  %v1687_v17 = vadd.f32 %v1686_v15, %v1685_v11  ;;  %v1640_v18 = vpop.f32.mrb[26].mxu0  ;;  %v1688_v19 = vpop.f32.mrb[26].mxu1 }
 0x135   : > { %v1038_v22 = vmax.f32 %v1006_v12, 0.0  ;;  %v1054_v23 = vmax.f32 %v1022_v13, 0.0  ;;  %v1641_v24 = vpop.f32.mrb[27].mxu0  ;;  %v1689_v25 = vpop.f32.mrb[27].mxu1 }
 0x136   : > { %v968_v26 = vmul.f32 %v1639_v16, %v2086_v51  ;;  %v984_v27 = vmul.f32 %v1687_v17, %v2086_v51  ;;  %v1642_v28 = vadd.f32 %v1641_v24, %v1640_v18  ;;  %v1690_v29 = vadd.f32 %v1689_v25, %v1688_v19 }
 0x137   : > { %v1518_v30 = vpack.c.bf16 %v1038_v22, %v1037_v20  ;;  %v1558_v31 = vpack.c.bf16 %v1054_v23, %v1053_v21 }
 0x138   : > { %v1007_v32 = vadd.f32 %v2091_v57, %v968_v26  ;;  %v1023_v33 = vadd.f32 %v2091_v57, %v984_v27  ;;  %v969_v34 = vmul.f32 %v1642_v28, %v2086_v51  ;;  %v985_v35 = vmul.f32 %v1690_v29, %v2086_v51 }
 0x139   : > { %1574 = vst [vmem:[%s2106_s14 + $0x28] sm:$0xff] %v1518_v30   ;;  %1582 = vst [vmem:[%s2106_s14 + $0x68] sm:$0xff] %v1558_v31  }
 0x13a   : > { %v1008_v36 = vadd.f32 %v2091_v57, %v969_v34  ;;  %v1024_v37 = vadd.f32 %v2091_v57, %v985_v35  ;;  %v1643_v38 = vpop.f32.mrb[28].mxu0  ;;  %v1691_v39 = vpop.f32.mrb[28].mxu1  ;;  %v1039_v40 = vmax.f32 %v1007_v32, 0.0  ;;  %v1055_v41 = vmax.f32 %v1023_v33, 0.0 }
 0x13b   : > { %v1644_v42 = vpop.f32.mrb[29].mxu0  ;;  %v1692_v43 = vpop.f32.mrb[29].mxu1 }
 0x13c   : > { %v1040_v44 = vmax.f32 %v1008_v36, 0.0  ;;  %v1056_v45 = vmax.f32 %v1024_v37, 0.0  ;;  %v1645_v46 = vadd.f32 %v1644_v42, %v1643_v38  ;;  %v1693_v47 = vadd.f32 %v1692_v43, %v1691_v39  ;;  %v1646_v48 = vpop.f32.mrb[30].mxu0  ;;  %v1694_v49 = vpop.f32.mrb[30].mxu1 }
 0x13d   : > { %v1647_v50 = vpop.f32.mrb[31].mxu0  ;;  %v1695_v52 = vpop.f32.mrb[31].mxu1 }
 0x13e   : > { %v1523_v53 = vpack.c.bf16 %v1040_v44, %v1039_v40  ;;  %v1563_v54 = vpack.c.bf16 %v1056_v45, %v1055_v41  ;;  %v970_v55 = vmul.f32 %v1645_v46, %v2086_v51  ;;  %v986_v56 = vmul.f32 %v1693_v47, %v2086_v51 }
 0x13f   : > { %v1648_v58 = vadd.f32 %v1647_v50, %v1646_v48  ;;  %v1696_v59 = vadd.f32 %v1695_v52, %v1694_v49 }
 0x140   : > { %1575 = vst [vmem:[%s2106_s14 + $0x30] sm:$0xff] %v1523_v53   ;;  %1583 = vst [vmem:[%s2106_s14 + $0x70] sm:$0xff] %v1563_v54   ;;  %v1009_v60 = vadd.f32 %v2091_v57, %v970_v55  ;;  %v1025_v61 = vadd.f32 %v2091_v57, %v986_v56 }
 0x141   : > { %v971_v62 = vmul.f32 %v1648_v58, %v2086_v51  ;;  %v987_v63 = vmul.f32 %v1696_v59, %v2086_v51 }
 0x142   : > { %v1041_v2 = vmax.f32 %v1009_v60, 0.0  ;;  %v1057_v3 = vmax.f32 %v1025_v61, 0.0 }
 0x143   : > { %v1010_v0 = vadd.f32 %v2091_v57, %v971_v62  ;;  %v1026_v1 = vadd.f32 %v2091_v57, %v987_v63 }
 0x145   : > { %v1042_v4 = vmax.f32 %v1010_v0, 0.0  ;;  %v1058_v5 = vmax.f32 %v1026_v1, 0.0 }
 0x147   : > { %v1528_v51 = vpack.c.bf16 %v1042_v4, %v1041_v2  ;;  %v1568_v6 = vpack.c.bf16 %v1058_v5, %v1057_v3 }
 0x149   : > { %1576 = vst [vmem:[%s2106_s14 + $0x38] sm:$0xff] %v1528_v51   ;;  %1584 = vst [vmem:[%s2106_s14 + $0x78] sm:$0xff] %v1568_v6  }
 0x14a   : > { %1847 = shalt.err (!%p1844_p5)
}
 0x14b   : > { %s1848_s9 = scalar_lea.hbm %s2181_s29, 2048  ;;  %s1852_s5 = scalar_lea.hbm %s2239_s4, 4096 }
 0x14c   : > { %p1849_p6 = scmp.ne.s32.totalorder %s2181_s29, %s1848_s9  ;;  %p1853_p10 = scmp.lt.u32.totalorder %s2181_s29, %s2239_s4 }
 0x14d   : > { %p1854_p11 = scmp.lt.u32.totalorder %s1852_s5, %s1848_s9  ;;  %p1856_p13 = scmp.lt.u32.totalorder %s1848_s9, %s2181_s29 }
 0x14e   : > { %p1850_p7 = pnand %p1849_p6, %p1982_p4 }
 0x14f   : > { %p1855_p12 = por %p1854_p11, %p1853_p10 }
 0x150   : > { %p1851_p9 = pneg %p1850_p7 }
 0x151   : > { %p1857_p0 = por %p1856_p13, %p1855_p12 }
 0x153   : > { %p1858_p1 = pnand %p1857_p0, %p1851_p9 }
 0x155   : > { %1861 = shalt.err (!%p1858_p1)
}
 0x156   : > { %s1915_s14 = smov 64   ;;  %s1916_s21 = smov 4  }
 0x157   : > { %1713 = dma.vmem_to_hbm [thread:$0]  (%p1982_p4), %s2183_s22, 2048, %s2181_s29, %s2189_s18, %s1915_s14, %s1915_s14, %s1916_s21  }
 0x158 PF: > { %p1719_p2 = scmp.ge.s32.totalorder %s1912_s20, 2  ;;  %s1249_s24 = sand.u32 1, %s1892_s15  }
 0x159   : > { %s1250_s26 = scalar_lea.sflag [#allocation4], %s1249_s24 }
 0x15a   : > { %p1716_p3 = pnand %p1719_p2, %p1989_p8 }
 0x15c   : > { %1887 = dma.done.wait (!%p1716_p3), %s1250_s26, 2048  }
 0x15d   : > { %1889 = vsyncadd (!%p1716_p3), %s1250_s26, 4294965248  ;;  %s17_s20 = sadd.s32 1, %s1912_s20   ;;  %s2242_s15 = smov %s1896_s16 }
 0x15e   : > { %p14_p5 = scmp.ge.s32.totalorder %s17_s20, 4   ;;  %s2243_s16 = smov %s1900_s17 }
 0x15f   : > { %s2244_s17 = smov %s1995_s28  ;;  %s2245_s18 = smov %s1908_s19 }
 0x160   : > { %s2246_s19 = smov %s2248_s23  ;;  %16 = sbr.rel (!%p14_p5) target bundleno = 4 (0x4), region = 88 }
 0x167   :  { %1255 = vsyncpa [#allocation4], 1 }
 0x168   :  { %1257 = vsyncpa [#allocation4 + $0x1], 1 }

</bundles_post_ra>
